<compile_context>
chip_gen: v7x
topology: tpu7x:2x2x1
jax: 0.10.0
libtpu: 0.0.40
codegen_flags: <defaults>
</compile_context>

<pallas_src>
import jax
import jax.numpy as jnp
from jax import lax
from jax.experimental import pallas as pl
from jax.experimental.pallas import tpu as pltpu


def _linear_kernel(x_ref, w_ref, b_ref, o_ref):
    """One (tm, tn) output tile; the f32 output block is the K accumulator."""
    k = pl.program_id(2)

    @pl.when(k == 0)
    def _():
        # Seed the resident output block with the bias (broadcast over rows).
        o_ref[...] = jnp.broadcast_to(b_ref[...], o_ref.shape).astype(o_ref.dtype)

    # x tile: (tm, tk); w tile: (tn, tk) -> contract over the shared last dim
    # (i.e. x @ w.T) directly on the MXU; accumulate into the output block.
    o_ref[...] += lax.dot_general(
        x_ref[...], w_ref[...],
        dimension_numbers=(((1,), (1,)), ((), ())),
        preferred_element_type=jnp.float32,
    ).astype(o_ref.dtype)


def _round_up(x, m):
    return (x + m - 1) // m * m


def _choose_tile(dim, align, cap):
    """Pick (block_size, padded_extent) for one dimension.

    If the dim fits in one block, take it whole: a block dim equal to the array
    dim is always legal, so no alignment padding is needed at all.  Otherwise
    split into equal `align`-multiple tiles with near-minimal padding.
    """
    if dim <= cap:
        return dim, dim
    n_tiles = -(-dim // cap)                       # ceil(dim / cap)
    tile = _round_up(-(-dim // n_tiles), align)    # ceil(dim / n_tiles), aligned
    return tile, tile * n_tiles


def multi_outs_mse_forward(x, weight, bias, *, tm_cap=512, tn_cap=512, tk_cap=2048):
    """Equivalent of MultiOutsMSE.forward: x @ weight.T + bias.

    Args:
      x:      (batch, hidden_dim) float32
      weight: (out_dim, hidden_dim) float32  (PyTorch nn.Linear convention)
      bias:   (out_dim,) float32
    Returns:
      (batch, out_dim) float32
    """
    batch, hidden = x.shape
    out_dim, hidden_w = weight.shape
    assert hidden_w == hidden and bias.shape == (out_dim,)

    tm, pm = _choose_tile(batch, 8, tm_cap)
    tn, pn = _choose_tile(out_dim, 128, tn_cap)
    tk, pk = _choose_tile(hidden, 128, tk_cap)

    # Pad only when a dim had to be split into tiles that don't cover it exactly
    # (large dims only; realistic module shapes take the no-copy path). Zero K
    # padding contributes nothing; padded M/N rows/cols are sliced off below.
    xp = x if (pm == batch and pk == hidden) else jnp.pad(
        x, ((0, pm - batch), (0, pk - hidden)))
    wp = weight if (pn == out_dim and pk == hidden) else jnp.pad(
        weight, ((0, pn - out_dim), (0, pk - hidden)))
    bp = (bias if pn == out_dim else jnp.pad(bias, (0, pn - out_dim))).reshape(1, pn)

    gm, gn, gk = pm // tm, pn // tn, pk // tk
    grid = (gm, gn, gk)

    itemsize = jnp.dtype(x.dtype).itemsize
    # Double-buffered input tiles + resident/double-buffered output tile.
    buf_bytes = 2 * (tm * tk + tn * tk + tn) * itemsize + 2 * tm * tn * itemsize

    # Triple-buffer the weight DMA only when its block actually changes across
    # grid steps (skinny-batch compute is too short to hide it with 2 buffers).
    w_spec_kwargs = {}
    if gn * gk >= 3 and buf_bytes + tn * tk * itemsize < 24 * 1024 * 1024:
        w_spec_kwargs["pipeline_mode"] = pl.Buffered(3)
        buf_bytes += tn * tk * itemsize

    # Raise the scoped-VMEM limit only when we'd exceed v5e's 16 MiB default.
    vmem_limit = None
    if buf_bytes > 14 * 1024 * 1024:
        vmem_limit = min(int(buf_bytes * 3 // 2) + (2 << 20), 48 * 1024 * 1024)

    out = pl.pallas_call(
        _linear_kernel,
        out_shape=jax.ShapeDtypeStruct((pm, pn), x.dtype),
        grid=grid,
        in_specs=[
            pl.BlockSpec((tm, tk), lambda i, j, k: (i, k)),                   # x tile
            pl.BlockSpec((tn, tk), lambda i, j, k: (j, k), **w_spec_kwargs),  # weight tile
            pl.BlockSpec((1, tn), lambda i, j, k: (0, j)),                    # bias row
        ],
        out_specs=pl.BlockSpec((tm, tn), lambda i, j, k: (i, j)),
        compiler_params=pltpu.CompilerParams(
            dimension_semantics=("parallel", "parallel", "arbitrary"),
            vmem_limit_bytes=vmem_limit,
        ),
    )(xp, wp, bp)

    if pm != batch or pn != out_dim:
        out = out[:batch, :out_dim]
    return out


if __name__ == "__main__":
    key = jax.random.PRNGKey(0)

    def _check(batch, hidden_dim, out_dim, key, **caps):
        kx, kw, kb = jax.random.split(key, 3)
        bound = 1.0 / (hidden_dim ** 0.5)
        x = jax.random.normal(kx, (batch, hidden_dim), dtype=jnp.float32)
        weight = jax.random.uniform(kw, (out_dim, hidden_dim), dtype=jnp.float32,
                                    minval=-bound, maxval=bound)
        bias = jax.random.uniform(kb, (out_dim,), dtype=jnp.float32,
                                  minval=-bound, maxval=bound)

        out = multi_outs_mse_forward(x, weight, bias, **caps)
        out = jax.block_until_ready(out)

        ref = x @ weight.T + bias
        assert out.shape == (batch, out_dim)
        assert jnp.allclose(out, ref, atol=1e-4, rtol=1e-4)

    k1, k2, k3 = jax.random.split(key, 3)
    # Small shapes implied by the module: hidden_dim -> out_dim linear head.
    # Single-block, zero-padding fast path.
    _check(batch=2, hidden_dim=32, out_dim=8, key=k1)
    # Larger head, still a single un-padded block per operand (grid (1,1,1)).
    _check(batch=16, hidden_dim=1024, out_dim=300, key=k2)
    # Force the tiled path (K accumulation, M/N tiling, minimal padding and the
    # Buffered(3) weight pipeline) with tiny caps so shapes stay small.
    _check(batch=16, hidden_dim=640, out_dim=300, key=k3,
           tm_cap=8, tn_cap=128, tk_cap=256)

    print("KERNEL_OK")
</pallas_src>

<mosaic_0001>
module attributes {stable_mosaic.version = 11 : i64} {
  func.func @_linear_kernel(%arg0: i32, %arg1: i32, %arg2: i32, %arg3: memref<2x32xf32, #tpu.memory_space<vmem>>, %arg4: memref<8x32xf32, #tpu.memory_space<vmem>>, %arg5: memref<1x8xf32, #tpu.memory_space<vmem>>, %arg6: memref<2x8xf32, #tpu.memory_space<vmem>>) attributes {dimension_semantics = [#tpu.dimension_semantics<parallel>, #tpu.dimension_semantics<parallel>, #tpu.dimension_semantics<arbitrary>], iteration_bounds = array<i64: 1, 1, 1>, scalar_prefetch = 0 : i64, scratch_operands = 0 : i64, tpu.core_type = #tpu.core_type<tc>, window_params = [{transform_indices = @transform_0, window_bounds = array<i64: 2, 32>}, {transform_indices = @transform_1, window_bounds = array<i64: 8, 32>}, {transform_indices = @transform_2, window_bounds = array<i64: 1, 8>}, {transform_indices = @transform_3, window_bounds = array<i64: 2, 8>}]} {
    %c0_i32 = arith.constant 0 : i32
    %0 = arith.cmpi eq, %arg2, %c0_i32 : i32
    %1 = arith.extui %0 : i1 to i32
    %c0_i32_0 = arith.constant 0 : i32
    %2 = arith.cmpi ne, %1, %c0_i32_0 : i32
    scf.if %2 {
      %c0_8 = arith.constant 0 : index
      %c0_9 = arith.constant 0 : index
      %9 = vector.load %arg5[%c0_8, %c0_9] : memref<1x8xf32, #tpu.memory_space<vmem>>, vector<1x8xf32>
      %10 = vector.shape_cast %9 : vector<1x8xf32> to vector<1x8xf32>
      %11 = vector.broadcast %10 : vector<1x8xf32> to vector<2x8xf32>
      %c0_10 = arith.constant 0 : index
      %c0_11 = arith.constant 0 : index
      %12 = vector.load %arg6[%c0_10, %c0_11] : memref<2x8xf32, #tpu.memory_space<vmem>>, vector<2x8xf32>
      tpu.vector_store %arg6[%c0_10, %c0_11], %11 {strides = array<i32>} : memref<2x8xf32, #tpu.memory_space<vmem>>, vector<2x8xf32>,
    } else {
    }
    %c0 = arith.constant 0 : index
    %c0_1 = arith.constant 0 : index
    %3 = vector.load %arg6[%c0, %c0_1] : memref<2x8xf32, #tpu.memory_space<vmem>>, vector<2x8xf32>
    %c0_2 = arith.constant 0 : index
    %c0_3 = arith.constant 0 : index
    %4 = vector.load %arg3[%c0_2, %c0_3] : memref<2x32xf32, #tpu.memory_space<vmem>>, vector<2x32xf32>
    %c0_4 = arith.constant 0 : index
    %c0_5 = arith.constant 0 : index
    %5 = vector.load %arg4[%c0_4, %c0_5] : memref<8x32xf32, #tpu.memory_space<vmem>>, vector<8x32xf32>
    %cst = arith.constant dense<0.000000e+00> : vector<2x8xf32>
    %6 = tpu.matmul %4, %5, %cst {dimension_numbers = #tpu.dot_dimension_numbers<[1], [1], [0], [0], [0, 0, 1, 0], [], []>} : vector<2x32xf32>, vector<8x32xf32>, vector<2x8xf32> -> vector<2x8xf32>
    %7 = arith.addf %3, %6 : vector<2x8xf32>
    %c0_6 = arith.constant 0 : index
    %c0_7 = arith.constant 0 : index
    %8 = vector.load %arg6[%c0_6, %c0_7] : memref<2x8xf32, #tpu.memory_space<vmem>>, vector<2x8xf32>
    tpu.vector_store %arg6[%c0_6, %c0_7], %7 {strides = array<i32>} : memref<2x8xf32, #tpu.memory_space<vmem>>, vector<2x8xf32>,
    return
  }
  func.func @transform_0(%arg0: i32, %arg1: i32, %arg2: i32) -> (i32, i32) {
    %c0_i32 = arith.constant 0 : i32
    return %arg0, %arg2 : i32, i32
  }
  func.func @transform_1(%arg0: i32, %arg1: i32, %arg2: i32) -> (i32, i32) {
    %c0_i32 = arith.constant 0 : i32
    return %arg1, %arg2 : i32, i32
  }
  func.func @transform_2(%arg0: i32, %arg1: i32, %arg2: i32) -> (i32, i32) {
    %c0_i32 = arith.constant 0 : i32
    %c0_i32_0 = arith.constant 0 : i32
    return %c0_i32, %arg1 : i32, i32
  }
  func.func @transform_3(%arg0: i32, %arg1: i32, %arg2: i32) -> (i32, i32) {
    %c0_i32 = arith.constant 0 : i32
    return %arg0, %arg1 : i32, i32
  }
}

</mosaic_0001>

<bundles_post_ra>
// kernel: tpu_custom_call.1
= control target key start
LH: loop header
LB: loop body
LE: loop exit
PB: predicated region body
PF: predicated region fallthrough
CT: control target
= control target key end

     0   :  { %8 = vsyncpa [#allocation3], 0  ;;  %s302_s0 = inlined_call_operand.hbm [shape: f32[2,32], index: 0, kind: input, shape index: {}]   ;;  %s303_s1 = inlined_call_operand.hbm [shape: f32[8,32], index: 1, kind: input, shape index: {}]   ;;  %s304_s2 = inlined_call_operand.vmem [shape: f32[1,8], index: 2, kind: input, shape index: {}]   ;;  %s305_s3 = inlined_call_operand.hbm [shape: f32[2,8], index: 3, kind: output, shape index: {}]  }
   0x1   :  { %9 = vsyncpa [#allocation6], 0 }
   0x2   :  { %10 = vsyncpa [#allocation4], 0  ;;  %s238_s12 = smov [#allocation2]   ;;  %s239_s14 = smov [#allocation5]  }
   0x3   :  { %s17_s13 = sshll.u32 %s238_s12, 4  ;;  %s27_s15 = sshll.u32 %s239_s14, 4  ;;  %s18_s13 = int_to_ptr.vmem [resolvable:$true] %s17_s13  ;;  %s28_s15 = int_to_ptr.vmem [resolvable:$true] %s27_s15 }
   0x4   :  { %s166_s18 = scalar_lea.hbm %s302_s0, 32 }
   0x5   :  { %p167_p0 = scmp.ne.s32.totalorder %s302_s0, %s166_s18  ;;  %p170_p1 = scmp.lt.u32.totalorder %s166_s18, %s302_s0 }
   0x7   :  { %p172_p2 = pnand %p170_p1, %p167_p0 }
   0x9   :  { %175 = shalt.err (!%p172_p2)
}
   0xa   :  { %s176_s23 = scalar_lea.vmem %s18_s13, 32  ;;  %p181_p4 = scmp.lt.s32.totalorder %s18_s13, %s18_s13 }
   0xb   :  { %p177_p3 = scmp.ne.s32.totalorder %s18_s13, %s176_s23  ;;  %p182_p5 = scmp.lt.s32.totalorder %s176_s23, %s176_s23 }
   0xd   :  { %p183_p6 = por %p182_p5, %p181_p4 }
   0xf   :  { %p184_p7 = pnand %p183_p6, %p177_p3 }
  0x11   :  { %187 = shalt.err (!%p184_p7)
}
  0x12   :  { %20 = dma.hbm_to_vmem [thread:$0]  %s302_s0, 32, %s18_s13, [#allocation3]  }
  0x13   :  { %s188_s28 = scalar_lea.hbm %s303_s1, 128 }
  0x14   :  { %p189_p8 = scmp.ne.s32.totalorder %s303_s1, %s188_s28  ;;  %p192_p9 = scmp.lt.u32.totalorder %s188_s28, %s303_s1 }
  0x16   :  { %p194_p10 = pnand %p192_p9, %p189_p8 }
  0x18   :  { %197 = shalt.err (!%p194_p10)
}
  0x19   :  { %s198_s6 = scalar_lea.vmem %s28_s15, 128  ;;  %p203_p12 = scmp.lt.s32.totalorder %s28_s15, %s28_s15 }
  0x1a   :  { %p199_p11 = scmp.ne.s32.totalorder %s28_s15, %s198_s6  ;;  %p204_p13 = scmp.lt.s32.totalorder %s198_s6, %s198_s6 }
  0x1c   :  { %p205_p0 = por %p204_p13, %p203_p12 }
  0x1e   :  { %p206_p1 = pnand %p205_p0, %p199_p11 }
  0x20   :  { %209 = shalt.err (!%p206_p1)
}
  0x21   :  { %30 = dma.hbm_to_vmem [thread:$0]  %s303_s1, 128, %s28_s15, [#allocation6]  }
  0x22   :  { %232 = dma.done.wait [#allocation3], 32  }
  0x23   :  { %233 = vsyncadd [#allocation3], 4294967264 }
  0x24   :  { %234 = dma.done.wait [#allocation6], 128  }
  0x25   :  { %235 = vsyncadd [#allocation6], 4294967168  ;;  %v240_v0 = vmov 0.0   ;;  %vm241_vm0 = vmmov 0   ;;  %vm50_vm1 = vcmask 58368   ;;  %vm55_vm2 = vcmask 261120  }
  0x26   :  { %156 = vmatprep.subr.mxu0 %v240_v0  ;;  %158 = vmatprep.mubr.msk.f32.mxu0 %vm241_vm0, %v240_v0  ;;  %v151_v1 = vld [vmem:[%s304_s2] ss:$0 sm:$0xff]  ;;  %v54_v2 = vld [vmem:[#allocation5] sm:$0xff]  ;;  %s242_s1 = smov [#allocation7]  }
  0x27   :  { %51 = vst.msk [vmem:[#allocation7] sm:$0x3] %vm50_vm1, %v151_v1  ;;  %157 = vmatpush3.xpose.msk.msra.mxu0 %vm55_vm2, %v54_v2  ;;  %v53_v3 = vld [vmem:[#allocation2] sm:$0x3]  ;;  %s141_s10 = sshll.u32 %s242_s1, 4  ;;  %s142_s10 = int_to_ptr.vmem [resolvable:$true] %s141_s10 }
  0x28   :  { %s210_s11 = scalar_lea.vmem %s142_s10, 32  ;;  %p215_p3 = scmp.lt.s32.totalorder %s142_s10, %s142_s10 }
  0x29   :  { %p211_p2 = scmp.ne.s32.totalorder %s142_s10, %s210_s11  ;;  %p216_p4 = scmp.lt.s32.totalorder %s210_s11, %s210_s11 }
  0x2a   :  { %159 = vmatmul.mubr.msk.f32.vlgmr.msra.gmra.mrb[0].mxu0 %vm55_vm2, %v53_v3 }
  0x2b   :  { %p217_p5 = por %p216_p4, %p215_p3 }
  0x2d   :  { %p218_p6 = pnand %p217_p5, %p211_p2 }
  0x2e   :  { %v52_v4 = vld [vmem:[#allocation7] sm:$0x3] }
  0xfd   :  { %v128_v5 = vpop.f32.mrb[0].mxu0 }
  0xfe   :  { %v132_v6 = vadd.f32 %v128_v5, %v52_v4  ;;  %v160_v7 = vpop.f32.mrb[1].mxu0 }
 0x100   :  { %134 = vst.msk [vmem:[#allocation7] sm:$0x3] %vm50_vm1, %v132_v6 }
 0x101   :  { %221 = shalt.err (!%p218_p6)
}
 0x102   :  { %s222_s13 = scalar_lea.hbm %s305_s3, 32 }
 0x103   :  { %p223_p7 = scmp.ne.s32.totalorder %s305_s3, %s222_s13  ;;  %p226_p8 = scmp.lt.u32.totalorder %s222_s13, %s305_s3 }
 0x105   :  { %p228_p9 = pnand %p226_p8, %p223_p7 }
 0x107   :  { %231 = shalt.err (!%p228_p9)
}
 0x108   :  { %144 = dma.vmem_to_hbm [thread:$0]  %s142_s10, 32, %s305_s3, [#allocation4]  }
 0x109   :  { %236 = dma.done.wait [#allocation4], 32  }
 0x10a   :  { %237 = vsyncadd [#allocation4], 4294967264 }
 0x10b   :  { %148 = vsyncpa [#allocation3], 1 }
 0x10c   :  { %149 = vsyncpa [#allocation6], 1 }
 0x10d   :  { %150 = vsyncpa [#allocation4], 1 }

</bundles_post_ra>
